<compile_context>
chip_gen: v6e
topology: v6e:2x2x1
jax: 0.10.0
libtpu: 0.0.40
codegen_flags: <defaults>
</compile_context>

<pallas_src>
import jax
import jax.numpy as jnp
from jax.experimental import pallas as pl
from jax.experimental.pallas import tpu as pltpu


def _copy_kernel(x_ref, o_ref):
    # Pure pass-through on the current VMEM tile.
    o_ref[...] = x_ref[...]


def _round_up(v: int, m: int) -> int:
    return ((v + m - 1) // m) * m


def _sublane_multiple(dtype) -> int:
    """Minimum sublane granularity for packed layouts: 8 (4B), 16 (2B), 32 (1B)."""
    itemsize = jnp.dtype(dtype).itemsize
    return {4: 8, 2: 16, 1: 32}[itemsize]


def leader_swin_former_forward():
    """Faithful LeaderSwinFormer.forward(): no tensor args, body is `pass` -> None."""
    return None


def _pallas_copy_2d(x: jax.Array, *, block_byte_cap: int, gridless_byte_cap: int) -> jax.Array:
    """Identity copy via a Pallas TPU kernel (scaffold for future Swin math)."""
    rows, cols = x.shape
    itemsize = jnp.dtype(x.dtype).itemsize
    sub = _sublane_multiple(x.dtype)
    assert rows % sub == 0, f"rows must be a multiple of {sub} for dtype {x.dtype}"
    assert cols % 128 == 0, "cols must be a multiple of 128 (lane width)"

    total_bytes = rows * cols * itemsize
    cost = pl.CostEstimate(flops=0, transcendentals=0, bytes_accessed=2 * total_bytes)
    out_shape = jax.ShapeDtypeStruct((rows, cols), x.dtype)

    if total_bytes <= gridless_byte_cap:
        # Whole array in one block: no grid, no per-step overhead, one DMA
        # in / one out.  in+out <= 2 * gridless_byte_cap stays under every
        # chip's scoped VMEM default.
        return pl.pallas_call(
            _copy_kernel,
            out_shape=out_shape,
            input_output_aliases={0: 0},
            cost_estimate=cost,
        )(x)

    # ---- Tiled path: byte-capped, lane-dense blocks ----
    # Columns: keep full width when narrow; otherwise 2048-lane strips
    # (multiple of 512 lanes -> unmasked vst, lane-dense output).
    block_cols = cols if cols <= 2048 else 2048
    # Rows: derive from the per-block byte budget, multiple of the dtype's
    # sublane packing (8/16/32).
    block_rows = (block_byte_cap // (block_cols * itemsize)) // sub * sub
    block_rows = min(max(sub, block_rows), rows)

    grid_r = pl.cdiv(rows, block_rows)
    grid_c = pl.cdiv(cols, block_cols)

    # v7x has 2 TensorCores sharing the "parallel" axes: prefer an even number
    # of row steps so neither core is left with a straggler tile.
    if grid_r > 1 and (grid_r % 2) == 1 and block_rows > sub:
        block_rows = max(sub, _round_up(pl.cdiv(rows, grid_r + 1), sub))
        grid_r = pl.cdiv(rows, block_rows)

    grid_spec = pltpu.PrefetchScalarGridSpec(
        num_scalar_prefetch=0,
        grid=(grid_r, grid_c),
        in_specs=[pl.BlockSpec((block_rows, block_cols), lambda i, j: (i, j))],
        out_specs=pl.BlockSpec((block_rows, block_cols), lambda i, j: (i, j)),
    )
    return pl.pallas_call(
        _copy_kernel,
        out_shape=out_shape,
        grid_spec=grid_spec,
        input_output_aliases={0: 0},
        cost_estimate=cost,
        compiler_params=pltpu.CompilerParams(
            # Pure copy with disjoint output tiles: both axes are parallel
            # (megacore sharding on v7x; harmless serial loop on v5e/v6e).
            dimension_semantics=("parallel", "parallel"),
            # (1 in + 1 out) x 2 buffers x <=1 MiB tiles = <=4 MiB; explicit
            # ceiling leaves headroom on v5e (16 MiB scoped default) and stays
            # well under v7x's 64 MiB physical VMEM.
            vmem_limit_bytes=32 * 1024 * 1024,
        ),
    )(x)
    # NOTE: for very long grids a 3-deep pipeline (pl.Buffered(3)) can hide
    # writeback bubbles for a few %; left at the default depth here since the
    # scaffold's grids are short and the extra buffer costs VMEM on v5e/v7x.


def pallas_passthrough(
    x: jax.Array,
    *,
    force_kernel: bool = False,
    block_byte_cap: int = 1 << 20,      # ~1 MiB blocks: 85%+ of HBM roofline
    gridless_byte_cap: int = 6 << 20,   # in+out = 12 MiB, safe on v5e/v6e/v7x
) -> jax.Array:
    """Identity pass-through.

    Default (`force_kernel=False`): return `x` unchanged — a pure identity has
    zero semantic effect, so the 2x-bytes HBM copy is skipped entirely.
    With `force_kernel=True` the Pallas copy-kernel scaffold runs (gridless for
    small arrays, byte-capped tiled grid otherwise).
    """
    if not force_kernel:
        return x
    return _pallas_copy_2d(
        x, block_byte_cap=block_byte_cap, gridless_byte_cap=gridless_byte_cap
    )


if __name__ == "__main__":
    import numpy as np

    key = jax.random.PRNGKey(0)
    k_small, k_bf16, k_big = jax.random.split(key, 3)

    # Faithful module semantics: forward() takes no tensors and returns None.
    assert leader_swin_former_forward() is None

    # 0) Zero-copy identity path: no pallas_call, no HBM traffic.
    x_id = jax.random.normal(k_small, (8, 128), dtype=jnp.float32)
    assert pallas_passthrough(x_id) is x_id

    # 1) Small NCHW activation (batch=2, channels=4, spatial=16x16) flattened
    #    to (8, 256): gridless single-block kernel path.
    x_nchw = jax.random.normal(k_small, (2, 4, 16, 16), dtype=jnp.float32)
    x2d = x_nchw.reshape(2 * 4, 16 * 16)          # (8, 256)
    exp2d = np.asarray(x2d)                       # snapshot BEFORE aliased call
    y2d = jax.block_until_ready(pallas_passthrough(x2d, force_kernel=True))
    assert y2d.shape == exp2d.shape and np.allclose(np.asarray(y2d), exp2d), \
        "identity mismatch (small f32)"

    # 2) bf16 input: dtype-aware (16, 128) sublane packing, still gridless.
    x_bf16 = jax.random.normal(k_bf16, (32, 256), dtype=jnp.float32).astype(jnp.bfloat16)
    exp_bf16 = np.asarray(x_bf16.astype(jnp.float32))   # snapshot before call
    y_bf16 = jax.block_until_ready(pallas_passthrough(x_bf16, force_kernel=True))
    assert np.array_equal(np.asarray(y_bf16.astype(jnp.float32)), exp_bf16), \
        "identity mismatch (bf16)"

    # 3) Tiled "parallel" path: shrink the byte caps so a 2 MiB (1024, 512)
    #    f32 array splits into an even grid of 4 x 512 KiB lane-dense blocks.
    x_big = jax.random.normal(k_big, (1024, 512), dtype=jnp.float32)
    exp_big = np.asarray(x_big)                   # snapshot before aliased call
    y_big = jax.block_until_ready(
        pallas_passthrough(
            x_big,
            force_kernel=True,
            block_byte_cap=512 * 1024,
            gridless_byte_cap=512 * 1024,
        )
    )
    assert np.allclose(np.asarray(y_big), exp_big), "identity mismatch (tiled)"

    print("KERNEL_OK")
</pallas_src>

<mosaic_0001>
module attributes {stable_mosaic.version = 11 : i64} {
  func.func @_copy_kernel(%arg0: memref<8x256xf32, #tpu.memory_space<vmem>>, %arg1: memref<8x256xf32, #tpu.memory_space<vmem>>) attributes {dimension_semantics = [], scalar_prefetch = 0 : i64, scratch_operands = 0 : i64, tpu.core_type = #tpu.core_type<tc>} {
    %c0 = arith.constant 0 : index
    %c0_0 = arith.constant 0 : index
    %0 = vector.load %arg0[%c0, %c0_0] : memref<8x256xf32, #tpu.memory_space<vmem>>, vector<8x256xf32>
    %c0_1 = arith.constant 0 : index
    %c0_2 = arith.constant 0 : index
    %1 = vector.load %arg1[%c0_1, %c0_2] : memref<8x256xf32, #tpu.memory_space<vmem>>, vector<8x256xf32>
    tpu.vector_store %arg1[%c0_1, %c0_2], %0 {strides = array<i32>} : memref<8x256xf32, #tpu.memory_space<vmem>>, vector<8x256xf32>,
    return
  }
}

</mosaic_0001>

<bundles_post_ra>
// kernel: tpu_custom_call.1
= control target key start
LH: loop header
LB: loop body
LE: loop exit
PB: predicated region body
PF: predicated region fallthrough
CT: control target
= control target key end

     0   :  { %6 = vsyncpa [#allocation3], 0  ;;  %s104_s0 = inlined_call_operand.hbm [shape: f32[8,256], index: 0, kind: input, shape index: {}, may-alias: {0,1}]   ;;  %s105_s1 = inlined_call_operand.hbm [shape: f32[8,256], index: 1, kind: output, shape index: {}, may-alias: {0,1}]  }
   0x1   :  { %7 = vsyncpa [#allocation4], 0  ;;  %s86_s6 = smov [#allocation2]  }
   0x2   :  { %s14_s7 = sshll.u32 %s86_s6, 4  ;;  %s15_s7 = int_to_ptr.vmem [resolvable:$true] %s14_s7 }
   0x3   :  { %s50_s8 = scalar_lea.vmem %s15_s7, 256  ;;  %p55_p1 = scmp.lt.s32.totalorder %s15_s7, %s15_s7 }
   0x4   :  { %p51_p0 = scmp.ne.s32.totalorder %s15_s7, %s50_s8  ;;  %p56_p2 = scmp.lt.s32.totalorder %s50_s8, %s50_s8 }
   0x6   :  { %p57_p3 = por %p56_p2, %p55_p1 }
   0x8   :  { %p58_p4 = pnand %p57_p3, %p51_p0 }
   0xa   :  { %61 = shalt.err (!%p58_p4)
}
   0xb   :  { %17 = dma.hbm_to_vmem [thread:$0]  %s104_s0, 256, %s15_s7, [#allocation3]  }
   0xc   :  { %82 = dma.done.wait [#allocation3], 256  }
   0xd   :  { %83 = vsyncadd [#allocation3], 4294967040  ;;  %s87_s11 = smov [#allocation5]   ;;  %v21_v0 = vld [vmem:[#allocation2] sm:$0xff]  ;;  %v22_v1 = vld [vmem:[#allocation2 + $0x8] sm:$0xff] }
   0xe   :  { %s31_s12 = sshll.u32 %s87_s11, 4  ;;  %23 = vst [vmem:[#allocation5] sm:$0xff] %v21_v0  ;;  %24 = vst [vmem:[#allocation5 + $0x8] sm:$0xff] %v22_v1  ;;  %s32_s12 = int_to_ptr.vmem [resolvable:$true] %s31_s12 }
   0xf   :  { %s62_s13 = scalar_lea.vmem %s32_s12, 256  ;;  %p67_p6 = scmp.lt.s32.totalorder %s32_s12, %s32_s12 }
  0x10   :  { %p63_p5 = scmp.ne.s32.totalorder %s32_s12, %s62_s13  ;;  %p68_p7 = scmp.lt.s32.totalorder %s62_s13, %s62_s13 }
  0x12   :  { %p69_p8 = por %p68_p7, %p67_p6 }
  0x14   :  { %p70_p9 = pnand %p69_p8, %p63_p5 }
  0x16   :  { %73 = shalt.err (!%p70_p9)
}
  0x17   :  { %34 = dma.vmem_to_hbm [thread:$0]  %s32_s12, 256, %s105_s1, [#allocation4]  }
  0x18   :  { %84 = dma.done.wait [#allocation4], 256  }
  0x19   :  { %85 = vsyncadd [#allocation4], 4294967040 }
  0x1a   :  { %38 = vsyncpa [#allocation3], 1 }
  0x1b   :  { %39 = vsyncpa [#allocation4], 1 }

</bundles_post_ra>
